<compile_context>
chip_gen: v6e
topology: v6e:2x2x1
jax: 0.10.0
libtpu: 0.0.40
codegen_flags: <defaults>
</compile_context>

<pallas_src>
import functools

import jax
import jax.numpy as jnp
from jax import lax
from jax.experimental import pallas as pl
from jax.experimental.pallas import tpu as pltpu

LANE = 128
SUBLANE = 8
MAX_BATCH_TILE = 256          # M-tile for v6e/v7x (two MXU passes on v5e, still fine)
VMEM_LIMIT_BYTES = 32 * 1024 * 1024   # explicit budget; safe on v7x's 64 MiB VMEM


def _round_up(n, m):
    return ((n + m - 1) // m) * m


# ----------------------------------------------------------------------------
# Kernels
# ----------------------------------------------------------------------------
def _mlp_grad(y_f32, w1_ref, b1, w2_ref, b2, w3_ref, b3):
    """3-layer tanh MLP.

    Weights are read from their VMEM refs at every dot (low vreg pressure);
    biases arrive as already-materialized (pre-broadcast) f32 values.
    MXU operands are bf16, accumulation and elementwise math stay f32 (v5e-safe).
    """
    h = jnp.tanh(
        jnp.dot(y_f32.astype(jnp.bfloat16), w1_ref[...],
                preferred_element_type=jnp.float32) + b1)
    h = jnp.tanh(
        jnp.dot(h.astype(jnp.bfloat16), w2_ref[...],
                preferred_element_type=jnp.float32) + b2)
    return (jnp.dot(h.astype(jnp.bfloat16), w3_ref[...],
                    preferred_element_type=jnp.float32) + b3)


def ode_grad_kernel(y_ref, w1_ref, b1_ref, w2_ref, b2_ref, w3_ref, b3_ref,
                    out_ref, *, sign):
    """dy/dt = sign * gradient_net(y) for one batch tile."""
    g = _mlp_grad(y_ref[...].astype(jnp.float32),
                  w1_ref, b1_ref[...],
                  w2_ref, b2_ref[...],
                  w3_ref, b3_ref[...])
    out_ref[...] = (sign * g).astype(out_ref.dtype)


def ode_euler_kernel(y_ref, w1_ref, b1_ref, w2_ref, b2_ref, w3_ref, b3_ref,
                     out_ref, *, num_steps, dt, sign):
    """num_steps explicit-Euler steps for one batch tile, carry stays on-chip."""
    tb = y_ref.shape[0]
    # Hoist the bias broadcasts out of the step loop (JAX does not CSE them).
    b1 = jnp.broadcast_to(b1_ref[...], (tb, b1_ref.shape[-1]))
    b2 = jnp.broadcast_to(b2_ref[...], (tb, b2_ref.shape[-1]))
    b3 = jnp.broadcast_to(b3_ref[...], (tb, b3_ref.shape[-1]))
    scale = sign * dt  # static Python float

    def body(_, y):
        return y + scale * _mlp_grad(y, w1_ref, b1, w2_ref, b2, w3_ref, b3)

    # Serial recurrence: bounded unroll only (full unroll just inflates code
    # size / vreg live ranges).
    unroll = min(4, num_steps) if num_steps <= 32 else False
    y_final = lax.fori_loop(0, num_steps, body,
                            y_ref[...].astype(jnp.float32), unroll=unroll)
    out_ref[...] = y_final.astype(out_ref.dtype)


# ----------------------------------------------------------------------------
# pallas_call plumbing
# ----------------------------------------------------------------------------
def _choose_batch_tile(padded_batch):
    return padded_batch if padded_batch <= MAX_BATCH_TILE else MAX_BATCH_TILE


def _grid_call(kern, y_pad, padded_params, *, alias_state=False):
    (w1, b1), (w2, b2), (w3, b3) = padded_params
    Bp, Din = y_pad.shape
    Dh = w1.shape[1]
    Dout = w3.shape[1]
    TB = _choose_batch_tile(Bp)
    assert Bp % TB == 0

    kwargs = {}
    if alias_state:
        assert Din == Dout, "in-place state update needs matching in/out dims"
        kwargs["input_output_aliases"] = {0: 0}

    return pl.pallas_call(
        kern,
        out_shape=jax.ShapeDtypeStruct((Bp, Dout), jnp.float32),
        grid=(Bp // TB,),
        in_specs=[
            pl.BlockSpec((TB, Din), lambda i: (i, 0)),     # y tile (pipelined)
            pl.BlockSpec((Din, Dh), lambda i: (0, 0)),     # w1 (VMEM resident)
            pl.BlockSpec((1, Dh),   lambda i: (0, 0)),     # b1
            pl.BlockSpec((Dh, Dh),  lambda i: (0, 0)),     # w2
            pl.BlockSpec((1, Dh),   lambda i: (0, 0)),     # b2
            pl.BlockSpec((Dh, Dout), lambda i: (0, 0)),    # w3
            pl.BlockSpec((1, Dout), lambda i: (0, 0)),     # b3
        ],
        out_specs=pl.BlockSpec((TB, Dout), lambda i: (i, 0)),
        compiler_params=pltpu.CompilerParams(
            dimension_semantics=("parallel",),             # megacore on v7x
            vmem_limit_bytes=VMEM_LIMIT_BYTES),
        **kwargs,
    )(y_pad, w1, b1, w2, b2, w3, b3)


# ----------------------------------------------------------------------------
# Padded-layout entry points (pad once, stay padded across solver iterations)
# ----------------------------------------------------------------------------
def pad_state(y, feat_pad):
    """(B, L) -> (Bp, feat_pad) f32, zero-padded; keep this layout across calls."""
    B, _ = y.shape
    Bp = _round_up(max(B, SUBLANE), SUBLANE)
    if Bp > MAX_BATCH_TILE:
        Bp = _round_up(B, MAX_BATCH_TILE)
    return jnp.zeros((Bp, feat_pad), jnp.float32).at[:B, :y.shape[1]].set(y)


def unpad_state(y_pad, B, L):
    return y_pad[:B, :L]


def ode_func_forward_padded(y_pad, padded_params, backwards=False):
    """One ODEFunc.forward evaluation in padded layout: (Bp, Lp) -> (Bp, Lp)."""
    kern = functools.partial(ode_grad_kernel, sign=(-1.0 if backwards else 1.0))
    return _grid_call(kern, y_pad, padded_params)


def ode_integrate_euler_padded(y0_pad, padded_params, num_steps, dt,
                               backwards=False):
    """Fused multi-step Euler integration in padded layout, state aliased in place."""
    kern = functools.partial(ode_euler_kernel, num_steps=int(num_steps),
                             dt=float(dt), sign=(-1.0 if backwards else 1.0))
    return _grid_call(kern, y0_pad, padded_params, alias_state=True)


# ----------------------------------------------------------------------------
# Convenience wrappers (jit-ed so pad / kernel / slice fuse into one program)
# ----------------------------------------------------------------------------
@functools.partial(jax.jit, static_argnames=("backwards",))
def ode_func_forward(y, padded_params, backwards=False):
    B, L = y.shape
    y_pad = pad_state(y, padded_params[0][0].shape[0])
    out = ode_func_forward_padded(y_pad, padded_params, backwards)
    return unpad_state(out, B, L)


@functools.partial(jax.jit, static_argnames=("num_steps", "dt", "backwards"))
def ode_integrate_euler(y0, padded_params, num_steps, dt, backwards=False):
    B, L = y0.shape
    y_pad = pad_state(y0, padded_params[0][0].shape[0])
    out = ode_integrate_euler_padded(y_pad, padded_params, num_steps, dt,
                                     backwards)
    return unpad_state(out, B, L)


# ----------------------------------------------------------------------------
# Parameter construction (mimics init_network_weights: W ~ N(0, 0.1), b = 0)
# ----------------------------------------------------------------------------
def init_ode_func_params(key, latent_dim, n_units):
    """Weights stored (in_features, out_features), i.e. transposed vs nn.Linear."""
    k1, k2, k3 = jax.random.split(key, 3)

    def linear(k, fan_in, fan_out):
        w = 0.1 * jax.random.normal(k, (fan_in, fan_out), jnp.float32)
        b = jnp.zeros((fan_out,), jnp.float32)
        return w, b

    return [linear(k1, latent_dim, n_units),
            linear(k2, n_units, n_units),
            linear(k3, n_units, latent_dim)]


def pad_params_for_tpu(params):
    """Zero-pad all feature axes to 128-lane multiples.

    Weights are shipped bf16 (MXU operand dtype), biases stay f32.
    Invariant: padded rows/cols/bias entries are exactly zero, which keeps the
    un-padded region of the MLP output bit-identical to the unpadded math.
    """
    padded = []
    for w, b in params:
        fi, fo = w.shape
        fip, fop = _round_up(fi, LANE), _round_up(fo, LANE)
        wp = (jnp.zeros((fip, fop), jnp.float32)
              .at[:fi, :fo].set(w).astype(jnp.bfloat16))
        bp = jnp.zeros((1, fop), jnp.float32).at[0, :fo].set(b)
        padded.append((wp, bp))
    return padded


# ----------------------------------------------------------------------------
# Pure-JAX f32 references
# ----------------------------------------------------------------------------
def reference_grad(y, params, backwards=False):
    (w1, b1), (w2, b2), (w3, b3) = params
    h = jnp.tanh(y @ w1 + b1)
    h = jnp.tanh(h @ w2 + b2)
    g = h @ w3 + b3
    return -g if backwards else g


def reference_euler(y0, params, num_steps, dt, backwards=False):
    y = y0
    for _ in range(num_steps):
        y = y + dt * reference_grad(y, params, backwards)
    return y


# ----------------------------------------------------------------------------
if __name__ == "__main__":
    B, latent_dim, n_units = 8, 32, 64
    num_steps, dt = 8, 0.05

    key = jax.random.PRNGKey(0)
    k_y, k_p = jax.random.split(key)
    y = jax.random.normal(k_y, (B, latent_dim), jnp.float32)

    params = init_ode_func_params(k_p, latent_dim, n_units)
    padded_params = pad_params_for_tpu(params)

    # Single forward evaluation (ODEFunc.forward) -- forward and backwards.
    grad = jax.block_until_ready(ode_func_forward(y, padded_params))
    grad_bwd = jax.block_until_ready(
        ode_func_forward(y, padded_params, backwards=True))

    grad_ref = reference_grad(y, params)
    assert grad.shape == (B, latent_dim)
    assert jnp.allclose(grad, grad_ref, atol=2e-2, rtol=2e-2)
    assert jnp.allclose(grad_bwd, -grad_ref, atol=2e-2, rtol=2e-2)

    # Fused in-kernel Euler integration (step loop inside one pallas_call).
    y_T = jax.block_until_ready(
        ode_integrate_euler(y, padded_params, num_steps=num_steps, dt=dt))
    y_T_ref = reference_euler(y, params, num_steps, dt)
    assert y_T.shape == (B, latent_dim)
    assert jnp.allclose(y_T, y_T_ref, atol=2e-2, rtol=2e-2)

    print("KERNEL_OK")
</pallas_src>

<mosaic_0001>
module attributes {stable_mosaic.version = 11 : i64} {
  func.func @ode_grad_kernel(%arg0: i32, %arg1: memref<8x128xf32, #tpu.memory_space<vmem>>, %arg2: memref<128x128xbf16, #tpu.memory_space<vmem>>, %arg3: memref<1x128xf32, #tpu.memory_space<vmem>>, %arg4: memref<128x128xbf16, #tpu.memory_space<vmem>>, %arg5: memref<1x128xf32, #tpu.memory_space<vmem>>, %arg6: memref<128x128xbf16, #tpu.memory_space<vmem>>, %arg7: memref<1x128xf32, #tpu.memory_space<vmem>>, %arg8: memref<8x128xf32, #tpu.memory_space<vmem>>) attributes {dimension_semantics = [#tpu.dimension_semantics<parallel>], iteration_bounds = array<i64: 1>, scalar_prefetch = 0 : i64, scratch_operands = 0 : i64, tpu.core_type = #tpu.core_type<tc>, window_params = [{transform_indices = @transform_0, window_bounds = array<i64: 8, 128>}, {pipeline_mode = #tpu.pipeline_mode<synchronous>, transform_indices = @transform_1, window_bounds = array<i64: 128, 128>}, {pipeline_mode = #tpu.pipeline_mode<synchronous>, transform_indices = @transform_2, window_bounds = array<i64: 1, 128>}, {pipeline_mode = #tpu.pipeline_mode<synchronous>, transform_indices = @transform_3, window_bounds = array<i64: 128, 128>}, {pipeline_mode = #tpu.pipeline_mode<synchronous>, transform_indices = @transform_4, window_bounds = array<i64: 1, 128>}, {pipeline_mode = #tpu.pipeline_mode<synchronous>, transform_indices = @transform_5, window_bounds = array<i64: 128, 128>}, {pipeline_mode = #tpu.pipeline_mode<synchronous>, transform_indices = @transform_6, window_bounds = array<i64: 1, 128>}, {transform_indices = @transform_7, window_bounds = array<i64: 8, 128>}]} {
    %c0 = arith.constant 0 : index
    %c0_0 = arith.constant 0 : index
    %0 = vector.load %arg1[%c0, %c0_0] : memref<8x128xf32, #tpu.memory_space<vmem>>, vector<8x128xf32>
    %c0_1 = arith.constant 0 : index
    %c0_2 = arith.constant 0 : index
    %1 = vector.load %arg3[%c0_1, %c0_2] : memref<1x128xf32, #tpu.memory_space<vmem>>, vector<1x128xf32>
    %c0_3 = arith.constant 0 : index
    %c0_4 = arith.constant 0 : index
    %2 = vector.load %arg5[%c0_3, %c0_4] : memref<1x128xf32, #tpu.memory_space<vmem>>, vector<1x128xf32>
    %c0_5 = arith.constant 0 : index
    %c0_6 = arith.constant 0 : index
    %3 = vector.load %arg7[%c0_5, %c0_6] : memref<1x128xf32, #tpu.memory_space<vmem>>, vector<1x128xf32>
    %4 = arith.truncf %0 : vector<8x128xf32> to vector<8x128xbf16>
    %c0_7 = arith.constant 0 : index
    %c0_8 = arith.constant 0 : index
    %5 = vector.load %arg2[%c0_7, %c0_8] : memref<128x128xbf16, #tpu.memory_space<vmem>>, vector<128x128xbf16>
    %cst = arith.constant dense<0.000000e+00> : vector<8x128xf32>
    %6 = tpu.matmul %4, %5, %cst {dimension_numbers = #tpu.dot_dimension_numbers<[1], [0], [0], [1], [0, 0, 1, 1], [], []>} : vector<8x128xbf16>, vector<128x128xbf16>, vector<8x128xf32> -> vector<8x128xf32>
    %7 = vector.broadcast %1 : vector<1x128xf32> to vector<8x128xf32>
    %8 = arith.addf %6, %7 : vector<8x128xf32>
    %9 = math.tanh %8 : vector<8x128xf32>
    %10 = arith.truncf %9 : vector<8x128xf32> to vector<8x128xbf16>
    %c0_9 = arith.constant 0 : index
    %c0_10 = arith.constant 0 : index
    %11 = vector.load %arg4[%c0_9, %c0_10] : memref<128x128xbf16, #tpu.memory_space<vmem>>, vector<128x128xbf16>
    %cst_11 = arith.constant dense<0.000000e+00> : vector<8x128xf32>
    %12 = tpu.matmul %10, %11, %cst_11 {dimension_numbers = #tpu.dot_dimension_numbers<[1], [0], [0], [1], [0, 0, 1, 1], [], []>} : vector<8x128xbf16>, vector<128x128xbf16>, vector<8x128xf32> -> vector<8x128xf32>
    %13 = vector.broadcast %2 : vector<1x128xf32> to vector<8x128xf32>
    %14 = arith.addf %12, %13 : vector<8x128xf32>
    %15 = math.tanh %14 : vector<8x128xf32>
    %16 = arith.truncf %15 : vector<8x128xf32> to vector<8x128xbf16>
    %c0_12 = arith.constant 0 : index
    %c0_13 = arith.constant 0 : index
    %17 = vector.load %arg6[%c0_12, %c0_13] : memref<128x128xbf16, #tpu.memory_space<vmem>>, vector<128x128xbf16>
    %cst_14 = arith.constant dense<0.000000e+00> : vector<8x128xf32>
    %18 = tpu.matmul %16, %17, %cst_14 {dimension_numbers = #tpu.dot_dimension_numbers<[1], [0], [0], [1], [0, 0, 1, 1], [], []>} : vector<8x128xbf16>, vector<128x128xbf16>, vector<8x128xf32> -> vector<8x128xf32>
    %19 = vector.broadcast %3 : vector<1x128xf32> to vector<8x128xf32>
    %20 = arith.addf %18, %19 : vector<8x128xf32>
    %cst_15 = arith.constant 1.000000e+00 : f32
    %21 = vector.broadcast %cst_15 : f32 to vector<8x128xf32>
    %22 = arith.mulf %21, %20 : vector<8x128xf32>
    %c0_16 = arith.constant 0 : index
    %c0_17 = arith.constant 0 : index
    %23 = vector.load %arg8[%c0_16, %c0_17] : memref<8x128xf32, #tpu.memory_space<vmem>>, vector<8x128xf32>
    tpu.vector_store %arg8[%c0_16, %c0_17], %22 {strides = array<i32>} : memref<8x128xf32, #tpu.memory_space<vmem>>, vector<8x128xf32>,
    return
  }
  func.func @transform_0(%arg0: i32) -> (i32, i32) {
    %c0_i32 = arith.constant 0 : i32
    %c0_i32_0 = arith.constant 0 : i32
    return %arg0, %c0_i32 : i32, i32
  }
  func.func @transform_1(%arg0: i32) -> (i32, i32) {
    %c0_i32 = arith.constant 0 : i32
    %c0_i32_0 = arith.constant 0 : i32
    %c0_i32_1 = arith.constant 0 : i32
    return %c0_i32, %c0_i32_0 : i32, i32
  }
  func.func @transform_2(%arg0: i32) -> (i32, i32) {
    %c0_i32 = arith.constant 0 : i32
    %c0_i32_0 = arith.constant 0 : i32
    %c0_i32_1 = arith.constant 0 : i32
    return %c0_i32, %c0_i32_0 : i32, i32
  }
  func.func @transform_3(%arg0: i32) -> (i32, i32) {
    %c0_i32 = arith.constant 0 : i32
    %c0_i32_0 = arith.constant 0 : i32
    %c0_i32_1 = arith.constant 0 : i32
    return %c0_i32, %c0_i32_0 : i32, i32
  }
  func.func @transform_4(%arg0: i32) -> (i32, i32) {
    %c0_i32 = arith.constant 0 : i32
    %c0_i32_0 = arith.constant 0 : i32
    %c0_i32_1 = arith.constant 0 : i32
    return %c0_i32, %c0_i32_0 : i32, i32
  }
  func.func @transform_5(%arg0: i32) -> (i32, i32) {
    %c0_i32 = arith.constant 0 : i32
    %c0_i32_0 = arith.constant 0 : i32
    %c0_i32_1 = arith.constant 0 : i32
    return %c0_i32, %c0_i32_0 : i32, i32
  }
  func.func @transform_6(%arg0: i32) -> (i32, i32) {
    %c0_i32 = arith.constant 0 : i32
    %c0_i32_0 = arith.constant 0 : i32
    %c0_i32_1 = arith.constant 0 : i32
    return %c0_i32, %c0_i32_0 : i32, i32
  }
  func.func @transform_7(%arg0: i32) -> (i32, i32) {
    %c0_i32 = arith.constant 0 : i32
    %c0_i32_0 = arith.constant 0 : i32
    return %arg0, %c0_i32 : i32, i32
  }
}

</mosaic_0001>

<bundles_post_ra>
// kernel: ode_func_forward.1
= control target key start
LH: loop header
LB: loop body
LE: loop exit
PB: predicated region body
PF: predicated region fallthrough
CT: control target
= control target key end

     0   :  { %12 = vsyncpa [#allocation3], 0  ;;  %s763_s0 = inlined_call_operand.vmem [shape: f32[8,128], index: 0, kind: input, shape index: {}]   ;;  %s764_s1 = inlined_call_operand.hbm [shape: bf16[128,128], index: 1, kind: input, shape index: {}]   ;;  %s765_s2 = inlined_call_operand.vmem [shape: f32[1,128], index: 2, kind: input, shape index: {}]   ;;  %s766_s3 = inlined_call_operand.hbm [shape: bf16[128,128], index: 3, kind: input, shape index: {}]   ;;  %s767_s4 = inlined_call_operand.vmem [shape: f32[1,128], index: 4, kind: input, shape index: {}]   ;;  %s768_s5 = inlined_call_operand.hbm [shape: bf16[128,128], index: 5, kind: input, shape index: {}]   ;;  %s769_s6 = inlined_call_operand.vmem [shape: f32[1,128], index: 6, kind: input, shape index: {}]   ;;  %s770_s7 = inlined_call_operand.hbm [shape: f32[8,128], index: 7, kind: output, shape index: {}]  }
   0x1   :  { %13 = vsyncpa [#allocation6], 0 }
   0x2   :  { %14 = vsyncpa [#allocation4], 0  ;;  %s661_s24 = smov [#allocation5]   ;;  %s662_s26 = smov [#allocation2]  }
   0x3   :  { %s36_s25 = sshll.u32 %s661_s24, 4  ;;  %s22_s27 = sshll.u32 %s662_s26, 4  ;;  %s37_s25 = int_to_ptr.vmem [resolvable:$true] %s36_s25  ;;  %s23_s27 = int_to_ptr.vmem [resolvable:$true] %s22_s27 }
   0x4   :  { %s583_s28 = scalar_lea.vmem %s37_s25, 1024  ;;  %p588_p1 = scmp.lt.s32.totalorder %s37_s25, %s37_s25 }
   0x5   :  { %p584_p0 = scmp.ne.s32.totalorder %s37_s25, %s583_s28  ;;  %p589_p2 = scmp.lt.s32.totalorder %s583_s28, %s583_s28 }
   0x7   :  { %p590_p3 = por %p589_p2, %p588_p1 }
   0x9   :  { %p591_p4 = pnand %p590_p3, %p584_p0 }
   0xb   :  { %594 = shalt.err (!%p591_p4)
}
   0xc   :  { %s663_s29 = smov 64   ;;  %s664_s30 = smov 4  }
   0xd   :  { %42 = dma.hbm_to_vmem [thread:$0]  %s766_s3, 1024, %s37_s25, [#allocation6], %s663_s29, %s663_s29, %s664_s30  }
   0xe   :  { %s603_s10 = scalar_lea.vmem %s23_s27, 1024  ;;  %p608_p6 = scmp.lt.s32.totalorder %s23_s27, %s23_s27 }
   0xf   :  { %p604_p5 = scmp.ne.s32.totalorder %s23_s27, %s603_s10  ;;  %p609_p7 = scmp.lt.s32.totalorder %s603_s10, %s603_s10 }
  0x11   :  { %p610_p8 = por %p609_p7, %p608_p6 }
  0x13   :  { %p611_p9 = pnand %p610_p8, %p604_p5 }
  0x15   :  { %614 = shalt.err (!%p611_p9)
}
  0x16   :  { %28 = dma.hbm_to_vmem [thread:$0]  %s764_s1, 1024, %s23_s27, [#allocation3], %s663_s29, %s663_s29, %s664_s30  }
  0x17   :  { %s665_s13 = smov [#allocation7]  }
  0x18   :  { %s50_s14 = sshll.u32 %s665_s13, 4  ;;  %s51_s14 = int_to_ptr.vmem [resolvable:$true] %s50_s14 }
  0x19   :  { %s623_s15 = scalar_lea.vmem %s51_s14, 1024  ;;  %p628_p11 = scmp.lt.s32.totalorder %s51_s14, %s51_s14 }
  0x1a   :  { %p624_p10 = scmp.ne.s32.totalorder %s51_s14, %s623_s15  ;;  %p629_p12 = scmp.lt.s32.totalorder %s623_s15, %s623_s15 }
  0x1c   :  { %p630_p13 = por %p629_p12, %p628_p11 }
  0x1e   :  { %p631_p0 = pnand %p630_p13, %p624_p10 }
  0x20   :  { %634 = shalt.err (!%p631_p0)
}
  0x21   :  { %56 = dma.hbm_to_vmem [thread:$0]  %s768_s5, 1024, %s51_s14, [#allocation6], %s663_s29, %s663_s29, %s664_s30  }
  0x22   :  { %655 = dma.done.wait [#allocation3], 1024  }
  0x23   :  { %656 = vsyncadd [#allocation3], 4294966272 }
  0x24   :  { %657 = dma.done.wait [#allocation6], 2048  }
  0x25   :  { %658 = vsyncadd [#allocation6], 4294965248  ;;  %v666_v0 = vmov 0.0   ;;  %vm667_vm0 = vmmov 0   ;;  %v547_v1 = vld [vmem:[#allocation2 + $0x38] sm:$0xff]   ;;  %v548_v2 = vld [vmem:[#allocation2 + $0x30] sm:$0xff]  }
  0x26   :  { %479 = vmatprep.subr.bf16.mxu0 %v666_v0  ;;  %495 = vmatprep.mubr.msk.bf16.mxu0 %vm667_vm0, %v666_v0  ;;  %v549_v3 = vld [vmem:[#allocation2 + $0x28] sm:$0xff]   ;;  %v555_v4 = vld [vmem:[#allocation5 + $0x38] sm:$0xff]   ;;  %v550_v5 = vld [vmem:[#allocation2 + $0x20] sm:$0xff]   ;;  %s668_s21 = smov [#allocation8]  }
  0x27   :  { %499 = vmatprep.subr.bf16.mxu1 %v666_v0  ;;  %515 = vmatprep.mubr.msk.bf16.mxu1 %vm667_vm0, %v666_v0  ;;  %v556_v6 = vld [vmem:[#allocation5 + $0x30] sm:$0xff]   ;;  %v551_v7 = vld [vmem:[#allocation2 + $0x18] sm:$0xff]   ;;  %v557_v8 = vld [vmem:[#allocation5 + $0x28] sm:$0xff]   ;;  %s415_s22 = sshll.u32 %s668_s21, 4  ;;  %s416_s22 = int_to_ptr.vmem [resolvable:$true] %s415_s22 }
  0x28   :  { %480 = vmatpush3.bf16.msra.mxu0 %v547_v1  ;;  %500 = vmatpush3.bf16.msra.mxu1 %v555_v4  ;;  %v552_v9 = vld [vmem:[#allocation2 + $0x10] sm:$0xff]   ;;  %v553_v10 = vld [vmem:[#allocation2 + $0x8] sm:$0xff]   ;;  %v554_v11 = vld [vmem:[#allocation2] sm:$0xff]   ;;  %p640_p2 = scmp.lt.s32.totalorder %s416_s22, %s416_s22 }
  0x29   :  { %481 = vmatprep.subr.bf16.mxu0 %v666_v0  ;;  %501 = vmatprep.subr.bf16.mxu1 %v666_v0  ;;  %v69_v12 = vld [vmem:[%s763_s0] sm:$0xff]  ;;  %v559_v15 = vld [vmem:[#allocation5 + $0x18] sm:$0xff]   ;;  %v560_v16 = vld [vmem:[#allocation5 + $0x10] sm:$0xff]  }
  0x2a   :  { %v73_v13 = vpack.c.bf16 %v69_v12, %v69_v12  ;;  %v558_v14 = vld [vmem:[#allocation5 + $0x20] sm:$0xff]   ;;  %v561_v17 = vld [vmem:[#allocation5 + $0x8] sm:$0xff]   ;;  %v563_v19 = vld [vmem:[#allocation7 + $0x38] sm:$0xff]  }
  0x2b   :  { %v562_v18 = vld [vmem:[#allocation5] sm:$0xff]   ;;  %v564_v20 = vld [vmem:[#allocation7 + $0x30] sm:$0xff]   ;;  %v565_v21 = vld [vmem:[#allocation7 + $0x28] sm:$0xff]  }
  0x2c   :  { %482 = vmatpush3.bf16.msra.mxu0 %v548_v2  ;;  %502 = vmatpush3.bf16.msra.mxu1 %v556_v6  ;;  %v425_v22 = vld [vmem:[%s765_s2] ss:$0 sm:$0xff]  ;;  %v567_v31 = vld [vmem:[#allocation7 + $0x18] sm:$0xff]   ;;  %v568_v32 = vld [vmem:[#allocation7 + $0x10] sm:$0xff]  }
  0x2d   :  { %483 = vmatprep.subr.bf16.mxu0 %v666_v0  ;;  %503 = vmatprep.subr.bf16.mxu1 %v666_v0  ;;  %v566_v30 = vld [vmem:[#allocation7 + $0x20] sm:$0xff]   ;;  %v569_v33 = vld [vmem:[#allocation7 + $0x8] sm:$0xff]  }
  0x2e   :  { %v570_v34 = vld [vmem:[#allocation7] sm:$0xff]  }
  0x2f   :  { %v434_v35 = vld [vmem:[%s767_s4] ss:$0 sm:$0xff]  ;;  %s635_s4 = scalar_lea.vmem %s416_s22, 128 }
  0x30   :  { %484 = vmatpush3.bf16.msra.mxu0 %v549_v3  ;;  %504 = vmatpush3.bf16.msra.mxu1 %v557_v8  ;;  %v443_v43 = vld [vmem:[%s769_s6] ss:$0 sm:$0xff]  ;;  %p636_p1 = scmp.ne.s32.totalorder %s416_s22, %s635_s4  ;;  %p641_p3 = scmp.lt.s32.totalorder %s635_s4, %s635_s4 }
  0x31   :  { %485 = vmatprep.subr.bf16.mxu0 %v666_v0  ;;  %505 = vmatprep.subr.bf16.mxu1 %v666_v0 }
  0x32   :  { %p642_p4 = por %p641_p3, %p640_p2 }
  0x34   :  { %486 = vmatpush3.bf16.msra.mxu0 %v550_v5  ;;  %506 = vmatpush3.bf16.msra.mxu1 %v558_v14  ;;  %p643_p5 = pnand %p642_p4, %p636_p1 }
  0x35   :  { %487 = vmatprep.subr.bf16.mxu0 %v666_v0  ;;  %507 = vmatprep.subr.bf16.mxu1 %v666_v0 }
  0x38   :  { %488 = vmatpush3.bf16.msra.mxu0 %v551_v7  ;;  %508 = vmatpush3.bf16.msra.mxu1 %v559_v15 }
  0x39   :  { %489 = vmatprep.subr.bf16.mxu0 %v666_v0  ;;  %509 = vmatprep.subr.bf16.mxu1 %v666_v0 }
  0x3c   :  { %490 = vmatpush3.bf16.msra.mxu0 %v552_v9  ;;  %510 = vmatpush3.bf16.msra.mxu1 %v560_v16 }
  0x3d   :  { %491 = vmatprep.subr.bf16.mxu0 %v666_v0  ;;  %511 = vmatprep.subr.bf16.mxu1 %v666_v0 }
  0x40   :  { %492 = vmatpush3.bf16.msra.mxu0 %v553_v10  ;;  %512 = vmatpush3.bf16.msra.mxu1 %v561_v17 }
  0x41   :  { %493 = vmatprep.subr.bf16.mxu0 %v666_v0  ;;  %513 = vmatprep.subr.bf16.mxu1 %v666_v0 }
  0x44   :  { %494 = vmatpush3.bf16.msra.mxu0 %v554_v11  ;;  %514 = vmatpush3.bf16.msra.mxu1 %v562_v18 }
  0x45   :  { %519 = vmatprep.subr.bf16.mxu0 %v666_v0 }
  0x47   :  { %496 = vmatmul.mubr.bf16.vlgmr.msra.gmra.mxu0 %v73_v13 }
  0x48   :  { %535 = vmatprep.mubr.msk.bf16.mxu0 %vm667_vm0, %v666_v0  ;;  %520 = vmatpush3.bf16.msra.mxu0 %v563_v19 }
  0x49   :  { %521 = vmatprep.subr.bf16.mxu0 %v666_v0 }
  0x4c   :  { %522 = vmatpush3.bf16.msra.mxu0 %v564_v20 }
  0x4d   :  { %523 = vmatprep.subr.bf16.mxu0 %v666_v0 }
  0x50   :  { %524 = vmatpush3.bf16.msra.mxu0 %v565_v21 }
  0x51   :  { %525 = vmatprep.subr.bf16.mxu0 %v666_v0 }
  0x54   :  { %526 = vmatpush3.bf16.msra.mxu0 %v566_v30 }
  0x55   :  { %527 = vmatprep.subr.bf16.mxu0 %v666_v0 }
  0x58   :  { %528 = vmatpush3.bf16.msra.mxu0 %v567_v31 }
  0x59   :  { %529 = vmatprep.subr.bf16.mxu0 %v666_v0 }
  0x5c   :  { %530 = vmatpush3.bf16.msra.mxu0 %v568_v32 }
  0x5d   :  { %531 = vmatprep.subr.bf16.mxu0 %v666_v0 }
  0x60   :  { %532 = vmatpush3.bf16.msra.mxu0 %v569_v33 }
  0x61   :  { %533 = vmatprep.subr.bf16.mxu0 %v666_v0 }
  0x64   :  { %534 = vmatpush3.bf16.msra.mxu0 %v570_v34 }
 0x107   :  { %v178_v23 = vpop.f32.mrf.mxu0 }
 0x108   :  { %v179_v24 = vadd.f32 %v425_v22, %v178_v23 }
 0x109   :  { %v497_v25 = vpop.f32.mrf.mxu0 }
 0x10a   :  { %571 = vtanh.f32 %v179_v24 }
 0x10b   :  { %v181_v26 = vpop.f32.mrf.mxu0 }
 0x10d   :  { %v498_v27 = vpop.f32.mrf.mxu0 }
 0x117   :  { %v572_v28 = vpop.eup %571 }
 0x118   :  { %v185_v29 = vpack.c.bf16 %v572_v28, %v572_v28 }
 0x11a   :  { %516 = vmatmul.mubr.bf16.vlgmr.msra.gmra.mxu1 %v185_v29 }
 0x1da   :  { %v290_v36 = vpop.f32.mrf.mxu1 }
 0x1db   :  { %v291_v37 = vadd.f32 %v434_v35, %v290_v36 }
 0x1dc   :  { %v517_v38 = vpop.f32.mrf.mxu1 }
 0x1dd   :  { %573 = vtanh.f32 %v291_v37 }
 0x1de   :  { %v293_v39 = vpop.f32.mrf.mxu1 }
 0x1e0   :  { %v518_v40 = vpop.f32.mrf.mxu1 }
 0x1ea   :  { %v574_v41 = vpop.eup %573 }
 0x1eb   :  { %v297_v42 = vpack.c.bf16 %v574_v41, %v574_v41 }
 0x1ed   :  { %536 = vmatmul.mubr.bf16.vlgmr.msra.gmra.mxu0 %v297_v42 }
 0x2ad   :  { %v402_v44 = vpop.f32.mrf.mxu0 }
 0x2ae   :  { %v403_v45 = vadd.f32 %v443_v43, %v402_v44 }
 0x2af   :  { %v537_v46 = vpop.f32.mrf.mxu0 }
 0x2b0   :  { %408 = vst [vmem:[#allocation8] sm:$0xff] %v403_v45 }
 0x2b1   :  { %v405_v47 = vpop.f32.mrf.mxu0 }
 0x2b2   :  { %646 = shalt.err (!%p643_p5)
}
 0x2b3   :  { %418 = dma.vmem_to_hbm [thread:$0]  %s416_s22, 128, %s770_s7, [#allocation4]   ;;  %v538_v48 = vpop.f32.mrf.mxu0 }
 0x2b4   :  { %659 = dma.done.wait [#allocation4], 128  }
 0x2b5   :  { %660 = vsyncadd [#allocation4], 4294967168 }
 0x2b6   :  { %422 = vsyncpa [#allocation3], 1 }
 0x2b7   :  { %423 = vsyncpa [#allocation6], 1 }
 0x2b8   :  { %424 = vsyncpa [#allocation4], 1 }

</bundles_post_ra>
